<compile_context>
chip_gen: v6e
topology: v6e:2x2x1
jax: 0.10.0
libtpu: 0.0.40
codegen_flags: <defaults>
</compile_context>

<pallas_src>
import functools

import jax
import jax.numpy as jnp
from jax.experimental import pallas as pl
from jax.experimental.pallas import tpu as pltpu

FC1_DIMS = 256
FC2_DIMS = 256
LANE = 128


def _round_up(x, m):
    return ((x + m - 1) // m) * m


def dqn_kernel(x_ref, w1_ref, b1_ref, w2_ref, b2_ref, w3_ref, b3_ref, out_ref):
    # Fused 3x (matmul + bias + ReLU/identity) on one (TM, *) batch tile.
    # bf16 MXU inputs, f32 accumulation (preferred_element_type), f32 VPU math.
    x = x_ref[...].astype(jnp.bfloat16)

    h1 = jnp.dot(x, w1_ref[...], preferred_element_type=jnp.float32) + b1_ref[...]
    h1 = jnp.maximum(h1, 0.0).astype(jnp.bfloat16)

    h2 = jnp.dot(h1, w2_ref[...], preferred_element_type=jnp.float32) + b2_ref[...]
    h2 = jnp.maximum(h2, 0.0).astype(jnp.bfloat16)

    out = jnp.dot(h2, w3_ref[...], preferred_element_type=jnp.float32) + b3_ref[...]
    out_ref[...] = out.astype(out_ref.dtype)


def _tile_plan(batch):
    """Pick (tm, b_pad) for the batch axis.

    <= 512 padded rows: one tile / one grid step (don't duplicate the weight
    DMA across v7x cores for a batch that can't feed both).  Larger: an even
    number of steps with tile <= 512 rows so two TensorCores balance.
    """
    b8 = _round_up(max(batch, 1), 8)
    if b8 <= 512:
        return b8, b8
    n_steps = -(-b8 // 512)          # ceil
    if n_steps % 2:
        n_steps += 1                 # even step count -> balanced megacore split
    tm = _round_up(-(-b8 // n_steps), 8)
    return tm, tm * n_steps


@functools.partial(jax.jit, static_argnames="nb_actions")
def dqn_forward(state, params, nb_actions):
    """state: (B, input_dim) f32.  params: pre-transposed bf16 weights,
    f32 biases, with w3/b3 already lane-padded to a multiple of 128."""
    B, in_dim = state.shape
    nout_pad = params["w3"].shape[1]

    tm, b_pad = _tile_plan(B)
    x = state if b_pad == B else jnp.pad(state, ((0, b_pad - B), (0, 0)))

    def resident(shape):
        # Constant index_map: block stays VMEM-resident across all grid steps.
        return pl.BlockSpec(shape, lambda i: (0, 0))

    out = pl.pallas_call(
        dqn_kernel,
        out_shape=jax.ShapeDtypeStruct((b_pad, nout_pad), jnp.float32),
        grid=(b_pad // tm,),
        in_specs=[
            pl.BlockSpec((tm, in_dim), lambda i: (i, 0)),   # state tile (streams)
            resident((in_dim, FC1_DIMS)),                   # w1
            resident((1, FC1_DIMS)),                        # b1
            resident((FC1_DIMS, FC2_DIMS)),                 # w2
            resident((1, FC2_DIMS)),                        # b2
            resident((FC2_DIMS, nout_pad)),                 # w3 (pre-padded)
            resident((1, nout_pad)),                        # b3 (pre-padded)
        ],
        out_specs=pl.BlockSpec((tm, nout_pad), lambda i: (i, 0)),
        compiler_params=pltpu.CompilerParams(
            dimension_semantics=("parallel",),              # v7x: 2 TCs share batch axis
        ),
    )(x, params["w1"], params["b1"], params["w2"], params["b2"],
      params["w3"], params["b3"])

    # TODO(synk): for per-step RL inference (B=1..32) the call is still
    # launch + weight-DMA bound; the next step is P10 cross-call weight
    # residency (a prior pallas_call starts the weight DMA and returns
    # (SEMAPHORE, VMEM) futures consumed here), or batching multiple env
    # states per invocation at the application level.
    # TODO(synk): on v7x only, w2/w3 could be stored fp8 (e4m3) to halve the
    # weight HBM traffic; kept bf16 here for v5e/v6e portability.
    return out[:B, :nb_actions]


def init_params(key, input_dim, fc1_dims, fc2_dims, nb_actions):
    """PyTorch nn.Linear-style init (uniform +/- 1/sqrt(fan_in)).

    Weights stored as (in, out) = W.T in bf16; biases as (1, out) in f32.
    The last layer is lane-padded to a multiple of 128 HERE (init-time layout
    plumbing) so the forward path dispatches no per-call pad/copy ops.
    """
    ks = jax.random.split(key, 6)

    def linear(kw, kb, fan_in, fan_out, pad_to=None):
        bound = 1.0 / jnp.sqrt(jnp.float32(fan_in))
        w = jax.random.uniform(kw, (fan_in, fan_out), jnp.float32, -bound, bound)
        b = jax.random.uniform(kb, (1, fan_out), jnp.float32, -bound, bound)
        if pad_to is not None and pad_to != fan_out:
            w = jnp.pad(w, ((0, 0), (0, pad_to - fan_out)))
            b = jnp.pad(b, ((0, 0), (0, pad_to - fan_out)))
        return w.astype(jnp.bfloat16), b

    nout_pad = _round_up(nb_actions, LANE)
    w1, b1 = linear(ks[0], ks[1], input_dim, fc1_dims)
    w2, b2 = linear(ks[2], ks[3], fc1_dims, fc2_dims)
    w3, b3 = linear(ks[4], ks[5], fc2_dims, nb_actions, pad_to=nout_pad)
    return {"w1": w1, "b1": b1, "w2": w2, "b2": b2, "w3": w3, "b3": b3}


def _ref_forward(x, p, nb_actions):
    # Matched-precision pure-JAX reference (bf16 MXU inputs, f32 accumulation).
    h1 = jnp.maximum(
        jnp.dot(x.astype(jnp.bfloat16), p["w1"], preferred_element_type=jnp.float32) + p["b1"], 0.0)
    h2 = jnp.maximum(
        jnp.dot(h1.astype(jnp.bfloat16), p["w2"], preferred_element_type=jnp.float32) + p["b2"], 0.0)
    out = jnp.dot(h2.astype(jnp.bfloat16), p["w3"], preferred_element_type=jnp.float32) + p["b3"]
    return out[:, :nb_actions]


if __name__ == "__main__":
    key = jax.random.PRNGKey(0)
    k_state, k_params = jax.random.split(key)

    # Small shapes implied by the module: input_dims=(8,), nb_actions=4, batch=2.
    batch, input_dim, nb_actions = 2, 8, 4

    state = jax.random.normal(k_state, (batch, input_dim), dtype=jnp.float32)
    params = init_params(k_params, input_dim, FC1_DIMS, FC2_DIMS, nb_actions)

    # Single-tile (one grid step) small-batch path.
    actions = dqn_forward(state, params, nb_actions)
    jax.block_until_ready(actions)
    assert actions.shape == (batch, nb_actions)
    assert jnp.allclose(actions, _ref_forward(state, params, nb_actions),
                        atol=1e-3, rtol=1e-3)

    # Multi-tile path: 1024 rows -> 2 balanced grid steps of TM=512.
    big_state = jax.random.normal(k_state, (1024, input_dim), dtype=jnp.float32)
    big_out = dqn_forward(big_state, params, nb_actions)
    jax.block_until_ready(big_out)
    assert big_out.shape == (1024, nb_actions)
    assert jnp.allclose(big_out, _ref_forward(big_state, params, nb_actions),
                        atol=1e-3, rtol=1e-3)

    # Ragged-batch path: 600 rows -> 2 steps of TM=304 (padded rows sliced off).
    odd_state = jax.random.normal(k_state, (600, input_dim), dtype=jnp.float32)
    odd_out = dqn_forward(odd_state, params, nb_actions)
    jax.block_until_ready(odd_out)
    assert odd_out.shape == (600, nb_actions)
    assert jnp.allclose(odd_out, _ref_forward(odd_state, params, nb_actions),
                        atol=1e-3, rtol=1e-3)

    print("KERNEL_OK")
</pallas_src>

<mosaic_0001>
module attributes {stable_mosaic.version = 11 : i64} {
  func.func @dqn_kernel(%arg0: i32, %arg1: memref<8x8xf32, #tpu.memory_space<vmem>>, %arg2: memref<8x256xbf16, #tpu.memory_space<vmem>>, %arg3: memref<1x256xf32, #tpu.memory_space<vmem>>, %arg4: memref<256x256xbf16, #tpu.memory_space<vmem>>, %arg5: memref<1x256xf32, #tpu.memory_space<vmem>>, %arg6: memref<256x128xbf16, #tpu.memory_space<vmem>>, %arg7: memref<1x128xf32, #tpu.memory_space<vmem>>, %arg8: memref<8x128xf32, #tpu.memory_space<vmem>>) attributes {dimension_semantics = [#tpu.dimension_semantics<parallel>], iteration_bounds = array<i64: 1>, scalar_prefetch = 0 : i64, scratch_operands = 0 : i64, tpu.core_type = #tpu.core_type<tc>, window_params = [{transform_indices = @transform_0, window_bounds = array<i64: 8, 8>}, {pipeline_mode = #tpu.pipeline_mode<synchronous>, transform_indices = @transform_1, window_bounds = array<i64: 8, 256>}, {pipeline_mode = #tpu.pipeline_mode<synchronous>, transform_indices = @transform_2, window_bounds = array<i64: 1, 256>}, {pipeline_mode = #tpu.pipeline_mode<synchronous>, transform_indices = @transform_3, window_bounds = array<i64: 256, 256>}, {pipeline_mode = #tpu.pipeline_mode<synchronous>, transform_indices = @transform_4, window_bounds = array<i64: 1, 256>}, {pipeline_mode = #tpu.pipeline_mode<synchronous>, transform_indices = @transform_5, window_bounds = array<i64: 256, 128>}, {pipeline_mode = #tpu.pipeline_mode<synchronous>, transform_indices = @transform_6, window_bounds = array<i64: 1, 128>}, {transform_indices = @transform_7, window_bounds = array<i64: 8, 128>}]} {
    %c0 = arith.constant 0 : index
    %c0_0 = arith.constant 0 : index
    %0 = vector.load %arg1[%c0, %c0_0] : memref<8x8xf32, #tpu.memory_space<vmem>>, vector<8x8xf32>
    %1 = arith.truncf %0 : vector<8x8xf32> to vector<8x8xbf16>
    %c0_1 = arith.constant 0 : index
    %c0_2 = arith.constant 0 : index
    %2 = vector.load %arg2[%c0_1, %c0_2] : memref<8x256xbf16, #tpu.memory_space<vmem>>, vector<8x256xbf16>
    %cst = arith.constant dense<0.000000e+00> : vector<8x256xf32>
    %3 = tpu.matmul %1, %2, %cst {dimension_numbers = #tpu.dot_dimension_numbers<[1], [0], [0], [1], [0, 0, 1, 1], [], []>} : vector<8x8xbf16>, vector<8x256xbf16>, vector<8x256xf32> -> vector<8x256xf32>
    %c0_3 = arith.constant 0 : index
    %c0_4 = arith.constant 0 : index
    %4 = vector.load %arg3[%c0_3, %c0_4] : memref<1x256xf32, #tpu.memory_space<vmem>>, vector<1x256xf32>
    %5 = vector.broadcast %4 : vector<1x256xf32> to vector<8x256xf32>
    %6 = arith.addf %3, %5 : vector<8x256xf32>
    %cst_5 = arith.constant 0.000000e+00 : f32
    %7 = vector.broadcast %cst_5 : f32 to vector<8x256xf32>
    %8 = arith.maximumf %6, %7 : vector<8x256xf32>
    %9 = arith.truncf %8 : vector<8x256xf32> to vector<8x256xbf16>
    %c0_6 = arith.constant 0 : index
    %c0_7 = arith.constant 0 : index
    %10 = vector.load %arg4[%c0_6, %c0_7] : memref<256x256xbf16, #tpu.memory_space<vmem>>, vector<256x256xbf16>
    %cst_8 = arith.constant dense<0.000000e+00> : vector<8x256xf32>
    %11 = tpu.matmul %9, %10, %cst_8 {dimension_numbers = #tpu.dot_dimension_numbers<[1], [0], [0], [1], [0, 0, 1, 1], [], []>} : vector<8x256xbf16>, vector<256x256xbf16>, vector<8x256xf32> -> vector<8x256xf32>
    %c0_9 = arith.constant 0 : index
    %c0_10 = arith.constant 0 : index
    %12 = vector.load %arg5[%c0_9, %c0_10] : memref<1x256xf32, #tpu.memory_space<vmem>>, vector<1x256xf32>
    %13 = vector.broadcast %12 : vector<1x256xf32> to vector<8x256xf32>
    %14 = arith.addf %11, %13 : vector<8x256xf32>
    %cst_11 = arith.constant 0.000000e+00 : f32
    %15 = vector.broadcast %cst_11 : f32 to vector<8x256xf32>
    %16 = arith.maximumf %14, %15 : vector<8x256xf32>
    %17 = arith.truncf %16 : vector<8x256xf32> to vector<8x256xbf16>
    %c0_12 = arith.constant 0 : index
    %c0_13 = arith.constant 0 : index
    %18 = vector.load %arg6[%c0_12, %c0_13] : memref<256x128xbf16, #tpu.memory_space<vmem>>, vector<256x128xbf16>
    %cst_14 = arith.constant dense<0.000000e+00> : vector<8x128xf32>
    %19 = tpu.matmul %17, %18, %cst_14 {dimension_numbers = #tpu.dot_dimension_numbers<[1], [0], [0], [1], [0, 0, 1, 1], [], []>} : vector<8x256xbf16>, vector<256x128xbf16>, vector<8x128xf32> -> vector<8x128xf32>
    %c0_15 = arith.constant 0 : index
    %c0_16 = arith.constant 0 : index
    %20 = vector.load %arg7[%c0_15, %c0_16] : memref<1x128xf32, #tpu.memory_space<vmem>>, vector<1x128xf32>
    %21 = vector.broadcast %20 : vector<1x128xf32> to vector<8x128xf32>
    %22 = arith.addf %19, %21 : vector<8x128xf32>
    %c0_17 = arith.constant 0 : index
    %c0_18 = arith.constant 0 : index
    %23 = vector.load %arg8[%c0_17, %c0_18] : memref<8x128xf32, #tpu.memory_space<vmem>>, vector<8x128xf32>
    tpu.vector_store %arg8[%c0_17, %c0_18], %22 {strides = array<i32>} : memref<8x128xf32, #tpu.memory_space<vmem>>, vector<8x128xf32>,
    return
  }
  func.func @transform_0(%arg0: i32) -> (i32, i32) {
    %c0_i32 = arith.constant 0 : i32
    %c0_i32_0 = arith.constant 0 : i32
    return %arg0, %c0_i32 : i32, i32
  }
  func.func @transform_1(%arg0: i32) -> (i32, i32) {
    %c0_i32 = arith.constant 0 : i32
    %c0_i32_0 = arith.constant 0 : i32
    %c0_i32_1 = arith.constant 0 : i32
    return %c0_i32, %c0_i32_0 : i32, i32
  }
  func.func @transform_2(%arg0: i32) -> (i32, i32) {
    %c0_i32 = arith.constant 0 : i32
    %c0_i32_0 = arith.constant 0 : i32
    %c0_i32_1 = arith.constant 0 : i32
    return %c0_i32, %c0_i32_0 : i32, i32
  }
  func.func @transform_3(%arg0: i32) -> (i32, i32) {
    %c0_i32 = arith.constant 0 : i32
    %c0_i32_0 = arith.constant 0 : i32
    %c0_i32_1 = arith.constant 0 : i32
    return %c0_i32, %c0_i32_0 : i32, i32
  }
  func.func @transform_4(%arg0: i32) -> (i32, i32) {
    %c0_i32 = arith.constant 0 : i32
    %c0_i32_0 = arith.constant 0 : i32
    %c0_i32_1 = arith.constant 0 : i32
    return %c0_i32, %c0_i32_0 : i32, i32
  }
  func.func @transform_5(%arg0: i32) -> (i32, i32) {
    %c0_i32 = arith.constant 0 : i32
    %c0_i32_0 = arith.constant 0 : i32
    %c0_i32_1 = arith.constant 0 : i32
    return %c0_i32, %c0_i32_0 : i32, i32
  }
  func.func @transform_6(%arg0: i32) -> (i32, i32) {
    %c0_i32 = arith.constant 0 : i32
    %c0_i32_0 = arith.constant 0 : i32
    %c0_i32_1 = arith.constant 0 : i32
    return %c0_i32, %c0_i32_0 : i32, i32
  }
  func.func @transform_7(%arg0: i32) -> (i32, i32) {
    %c0_i32 = arith.constant 0 : i32
    %c0_i32_0 = arith.constant 0 : i32
    return %arg0, %c0_i32 : i32, i32
  }
}

</mosaic_0001>

<bundles_post_ra>
// kernel: dqn_forward.1
= control target key start
LH: loop header
LB: loop body
LE: loop exit
PB: predicated region body
PF: predicated region fallthrough
CT: control target
= control target key end

     0   :  { %12 = vsyncpa [#allocation3], 0  ;;  %s825_s0 = inlined_call_operand.vmem [shape: f32[8,8], index: 0, kind: input, shape index: {}]   ;;  %s826_s1 = inlined_call_operand.vmem [shape: bf16[8,256], index: 1, kind: input, shape index: {}]   ;;  %s827_s2 = inlined_call_operand.vmem [shape: f32[1,256], index: 2, kind: input, shape index: {}]   ;;  %s828_s3 = inlined_call_operand.hbm [shape: bf16[256,256], index: 3, kind: input, shape index: {}]   ;;  %s829_s4 = inlined_call_operand.vmem [shape: f32[1,256], index: 4, kind: input, shape index: {}]   ;;  %s830_s5 = inlined_call_operand.hbm [shape: bf16[256,128], index: 5, kind: input, shape index: {}]   ;;  %s831_s6 = inlined_call_operand.vmem [shape: f32[1,128], index: 6, kind: input, shape index: {}]   ;;  %s832_s7 = inlined_call_operand.vmem [shape: f32[8,128], index: 7, kind: output, shape index: {}]  }
   0x1   :  { %13 = vsyncpa [#allocation5], 0  ;;  %s754_s24 = smov [#allocation2]  }
   0x2   :  { %s25_s25 = sshll.u32 %s754_s24, 4  ;;  %s26_s25 = int_to_ptr.vmem [resolvable:$true] %s25_s25 }
   0x3   :  { %s718_s26 = scalar_lea.vmem %s26_s25, 4096  ;;  %p723_p1 = scmp.lt.s32.totalorder %s26_s25, %s26_s25 }
   0x4   :  { %p719_p0 = scmp.ne.s32.totalorder %s26_s25, %s718_s26  ;;  %p724_p2 = scmp.lt.s32.totalorder %s718_s26, %s718_s26 }
   0x6   :  { %p725_p3 = por %p724_p2, %p723_p1 }
   0x8   :  { %p726_p4 = pnand %p725_p3, %p719_p0 }
   0xa   :  { %729 = shalt.err (!%p726_p4)
}
   0xb   :  { %s755_s27 = smov 128   ;;  %s756_s28 = smov 8  }
   0xc   :  { %31 = dma.hbm_to_vmem [thread:$0]  %s828_s3, 4096, %s26_s25, [#allocation3], %s755_s27, %s755_s27, %s756_s28  }
   0xd   :  { %s757_s8 = smov [#allocation4]  }
   0xe   :  { %s39_s9 = sshll.u32 %s757_s8, 4  ;;  %s40_s9 = int_to_ptr.vmem [resolvable:$true] %s39_s9 }
   0xf   :  { %s738_s10 = scalar_lea.vmem %s40_s9, 2048  ;;  %p743_p6 = scmp.lt.s32.totalorder %s40_s9, %s40_s9 }
  0x10   :  { %p739_p5 = scmp.ne.s32.totalorder %s40_s9, %s738_s10  ;;  %p744_p7 = scmp.lt.s32.totalorder %s738_s10, %s738_s10 }
  0x12   :  { %p745_p8 = por %p744_p7, %p743_p6 }
  0x14   :  { %p746_p9 = pnand %p745_p8, %p739_p5 }
  0x16   :  { %749 = shalt.err (!%p746_p9)
}
  0x17   :  { %s758_s11 = smov 64   ;;  %s759_s12 = smov 4  }
  0x18   :  { %45 = dma.hbm_to_vmem [thread:$0]  %s830_s5, 2048, %s40_s9, [#allocation5], %s758_s11, %s758_s11, %s759_s12  }
  0x19   :  { %750 = dma.done.wait [#allocation3], 4096  }
  0x1a   :  { %751 = vsyncadd [#allocation3], 4294963200 }
  0x1b   :  { %752 = dma.done.wait [#allocation5], 2048  }
  0x1c   :  { %753 = vsyncadd [#allocation5], 4294965248  ;;  %v760_v0 = vmov 0   ;;  %v57_v1 = vld [vmem:[%s826_s1] sm:$0xff]  ;;  %vm79_vm0 = vcmask 1043456   ;;  %vm75_vm1 = vcmask 64512   ;;  %v60_v51 = vlaneseq }
  0x1d   :  { %118 = vmatprep.mubr.bf16.mxu0 %v760_v0  ;;  %v55_v2 = vld [vmem:[%s825_s0] sm:$0xff]  ;;  %v563_v3 = vcombine.high %v57_v1, %v57_v1  ;;  %v562_v4 = vcombine.low %v57_v1, %v57_v1  ;;  %v646_v5 = vld [vmem:[#allocation2 + $0x74] ss:$8 sps:$4 sm:$0xff]   ;;  %v648_v6 = vld [vmem:[#allocation2 + $0x70] ss:$8 sps:$4 sm:$0xff]  }
  0x1e   :  { %v649_v7 = vld [vmem:[#allocation2 + $0x64] ss:$8 sps:$4 sm:$0xff]   ;;  %v56_v9 = vpack.c.bf16 %v55_v2, %v55_v2  ;;  %335 = vmatprep.subr.bf16.mxu1 %v646_v5  ;;  %v651_v10 = vld [vmem:[#allocation2 + $0x60] ss:$8 sps:$4 sm:$0xff]   ;;  %v652_v11 = vld [vmem:[#allocation2 + $0x54] ss:$8 sps:$4 sm:$0xff]  }
  0x1f   :  { %564 = vmatprep.subr.msk.bf16.mxu0 %vm79_vm0, %v563_v3  ;;  %v81_v8 = vsel %vm79_vm0, %v562_v4, 0  ;;  %336 = vmatpush1.bf16.msra.mxu1 %v648_v6  ;;  %v654_v12 = vld [vmem:[#allocation2 + $0x50] ss:$8 sps:$4 sm:$0xff]   ;;  %v655_v13 = vld [vmem:[#allocation2 + $0x44] ss:$8 sps:$4 sm:$0xff]   ;;  %v61_v52 = vshrl.u32 %v60_v51, 7 }
  0x20   :  { %101 = vmatpush1.bf16.msra.mxu0 %v81_v8  ;;  %337 = vmatprep.subr.bf16.mxu1 %v649_v7  ;;  %v657_v14 = vld [vmem:[#allocation2 + $0x40] ss:$8 sps:$4 sm:$0xff]   ;;  %v658_v15 = vld [vmem:[#allocation2 + $0x34] ss:$8 sps:$4 sm:$0xff]   ;;  %v660_v16 = vld [vmem:[#allocation2 + $0x30] ss:$8 sps:$4 sm:$0xff]  }
  0x21   :  { %v661_v17 = vld [vmem:[#allocation2 + $0x24] ss:$8 sps:$4 sm:$0xff]   ;;  %v663_v18 = vld [vmem:[#allocation2 + $0x20] ss:$8 sps:$4 sm:$0xff]   ;;  %v664_v19 = vld [vmem:[#allocation2 + $0x14] ss:$8 sps:$4 sm:$0xff]  }
  0x22   :  { %v666_v20 = vld [vmem:[#allocation2 + $0x10] ss:$8 sps:$4 sm:$0xff]   ;;  %v667_v21 = vld [vmem:[#allocation2 + $0x4] ss:$8 sps:$4 sm:$0xff]   ;;  %v669_v22 = vld [vmem:[#allocation2] ss:$8 sps:$4 sm:$0xff]  }
  0x23   :  { %565 = vmatmul.mubr.msk.bf16.vlgmr.msra.gmra.mxu0 %vm75_vm1, %v56_v9  ;;  %338 = vmatpush1.bf16.msra.mxu1 %v651_v10  ;;  %v670_v23 = vld [vmem:[#allocation2 + $0xf4] ss:$8 sps:$4 sm:$0xff]   ;;  %v672_v24 = vld [vmem:[#allocation2 + $0xf0] ss:$8 sps:$4 sm:$0xff]   ;;  %v673_v25 = vld [vmem:[#allocation2 + $0xe4] ss:$8 sps:$4 sm:$0xff]  }
  0x24   :  { %339 = vmatprep.subr.bf16.mxu1 %v652_v11  ;;  %v675_v26 = vld [vmem:[#allocation2 + $0xe0] ss:$8 sps:$4 sm:$0xff]   ;;  %v676_v27 = vld [vmem:[#allocation2 + $0xd4] ss:$8 sps:$4 sm:$0xff]   ;;  %v678_v28 = vld [vmem:[#allocation2 + $0xd0] ss:$8 sps:$4 sm:$0xff]  }
  0x25   :  { %v679_v29 = vld [vmem:[#allocation2 + $0xc4] ss:$8 sps:$4 sm:$0xff]   ;;  %v681_v30 = vld [vmem:[#allocation2 + $0xc0] ss:$8 sps:$4 sm:$0xff]   ;;  %v682_v31 = vld [vmem:[#allocation2 + $0xb4] ss:$8 sps:$4 sm:$0xff]  }
  0x26   :  { %v684_v32 = vld [vmem:[#allocation2 + $0xb0] ss:$8 sps:$4 sm:$0xff]   ;;  %v685_v33 = vld [vmem:[#allocation2 + $0xa4] ss:$8 sps:$4 sm:$0xff]   ;;  %v687_v34 = vld [vmem:[#allocation2 + $0xa0] ss:$8 sps:$4 sm:$0xff]  }
  0x27   :  { %340 = vmatpush1.bf16.msra.mxu1 %v654_v12  ;;  %v688_v35 = vld [vmem:[#allocation2 + $0x94] ss:$8 sps:$4 sm:$0xff]   ;;  %v690_v36 = vld [vmem:[#allocation2 + $0x90] ss:$8 sps:$4 sm:$0xff]   ;;  %v691_v37 = vld [vmem:[#allocation2 + $0x84] ss:$8 sps:$4 sm:$0xff]  }
  0x28   :  { %341 = vmatprep.subr.bf16.mxu1 %v655_v13  ;;  %v693_v38 = vld [vmem:[#allocation2 + $0x80] ss:$8 sps:$4 sm:$0xff]   ;;  %v694_v39 = vld [vmem:[#allocation4 + $0x78] sm:$0xff]   ;;  %v696_v41 = vld [vmem:[#allocation4 + $0x70] sm:$0xff]   ;;  %v62_v53 = vsub.s32 0, %v61_v52  ;;  %v66_v55 = vsub.s32 1, %v61_v52 }
  0x29   :  { %v695_v40 = vld [vmem:[#allocation4 + $0x38] sm:$0xff]   ;;  %615 = vmatprep.subr.bf16.mxu0 %v694_v39  ;;  %v697_v42 = vld [vmem:[#allocation4 + $0x30] sm:$0xff]   ;;  %v698_v43 = vld [vmem:[#allocation4 + $0x68] sm:$0xff]  }
  0x2a   :  { %616 = vmatpush3.bf16.msra.mxu0 %v695_v40  ;;  %v699_v44 = vld [vmem:[#allocation4 + $0x28] sm:$0xff]   ;;  %v700_v45 = vld [vmem:[#allocation4 + $0x60] sm:$0xff]   ;;  %v702_v47 = vld [vmem:[#allocation4 + $0x58] sm:$0xff]  }
  0x2b   :  { %342 = vmatpush1.bf16.msra.mxu1 %v657_v14  ;;  %617 = vmatprep.subr.bf16.mxu0 %v696_v41  ;;  %v701_v46 = vld [vmem:[#allocation4 + $0x20] sm:$0xff]   ;;  %v703_v48 = vld [vmem:[#allocation4 + $0x18] sm:$0xff]   ;;  %v704_v49 = vld [vmem:[#allocation4 + $0x50] sm:$0xff]  }
  0x2c   :  { %343 = vmatprep.subr.bf16.mxu1 %v658_v15  ;;  %v705_v50 = vld [vmem:[#allocation4 + $0x10] sm:$0xff]   ;;  %v58_v54 = vld [vmem:[%s827_s2] sm:$0x3]  ;;  %v706_v4 = vld [vmem:[#allocation4 + $0x48] sm:$0xff]  }
  0x2d   :  { %v63_v56 = vrot.slane %v58_v54, %v62_v53  ;;  %v67_v57 = vrot.slane %v58_v54, %v66_v55  ;;  %v707_v5 = vld [vmem:[#allocation4 + $0x8] sm:$0xff]   ;;  %v708_v6 = vld [vmem:[#allocation4 + $0x40] sm:$0xff]  }
  0x2e   :  { %618 = vmatpush3.bf16.msra.mxu0 %v697_v42  ;;  %v709_v7 = vld [vmem:[#allocation4] sm:$0xff]  }
  0x2f   :  { %344 = vmatpush1.bf16.msra.mxu1 %v660_v16  ;;  %619 = vmatprep.subr.bf16.mxu0 %v698_v43  ;;  %v163_v8 = vld [vmem:[%s829_s4] sm:$0x3] }
  0x30   :  { %345 = vmatprep.subr.bf16.mxu1 %v661_v17  ;;  %v168_v9 = vrot.slane %v163_v8, %v62_v53  ;;  %v172_v10 = vrot.slane %v163_v8, %v66_v55 }
  0x32   :  { %620 = vmatpush3.bf16.msra.mxu0 %v699_v44 }
  0x33   :  { %346 = vmatpush1.bf16.msra.mxu1 %v663_v18  ;;  %621 = vmatprep.subr.bf16.mxu0 %v700_v45 }
  0x34   :  { %347 = vmatprep.subr.bf16.mxu1 %v664_v19 }
  0x36   :  { %622 = vmatpush3.bf16.msra.mxu0 %v701_v46 }
  0x37   :  { %348 = vmatpush1.bf16.msra.mxu1 %v666_v20  ;;  %623 = vmatprep.subr.bf16.mxu0 %v702_v47 }
  0x38   :  { %349 = vmatprep.subr.bf16.mxu1 %v667_v21 }
  0x3a   :  { %624 = vmatpush3.bf16.msra.mxu0 %v703_v48 }
  0x3b   :  { %350 = vmatpush1.bf16.msra.mxu1 %v669_v22  ;;  %625 = vmatprep.subr.bf16.mxu0 %v704_v49  ;;  %v598_v22 = vld [vmem:[%s831_s6] ss:$0 sm:$0xff] }
  0x3c   :  { %351 = vmatprep.subr.bf16.mxu1 %v670_v23 }
  0x3e   :  { %626 = vmatpush3.bf16.msra.mxu0 %v705_v50 }
  0x3f   :  { %352 = vmatpush2.bf16.msra.mxu1 %v672_v24  ;;  %627 = vmatprep.subr.bf16.mxu0 %v706_v4 }
  0x40   :  { %353 = vmatprep.subr.bf16.mxu1 %v673_v25 }
  0x42   :  { %628 = vmatpush3.bf16.msra.mxu0 %v707_v5 }
  0x43   :  { %354 = vmatpush2.bf16.msra.mxu1 %v675_v26  ;;  %629 = vmatprep.subr.bf16.mxu0 %v708_v6 }
  0x44   :  { %355 = vmatprep.subr.bf16.mxu1 %v676_v27 }
  0x46   :  { %630 = vmatpush3.bf16.msra.mxu0 %v709_v7 }
  0x47   :  { %356 = vmatpush2.bf16.msra.mxu1 %v678_v28 }
  0x48   :  { %357 = vmatprep.subr.bf16.mxu1 %v679_v29 }
  0x4b   :  { %358 = vmatpush2.bf16.msra.mxu1 %v681_v30 }
  0x4c   :  { %359 = vmatprep.subr.bf16.mxu1 %v682_v31 }
  0x4f   :  { %360 = vmatpush2.bf16.msra.mxu1 %v684_v32 }
  0x50   :  { %361 = vmatprep.subr.bf16.mxu1 %v685_v33 }
  0x53   :  { %362 = vmatpush2.bf16.msra.mxu1 %v687_v34 }
  0x54   :  { %363 = vmatprep.subr.bf16.mxu1 %v688_v35 }
  0x57   :  { %364 = vmatpush2.bf16.msra.mxu1 %v690_v36 }
  0x58   :  { %365 = vmatprep.subr.bf16.mxu1 %v691_v37 }
  0x5b   :  { %366 = vmatpush2.bf16.msra.mxu1 %v693_v38 }
  0xe3   :  { %v120_v58 = vpop.f32.mrf.mxu0 }
  0xe4   :  { %v121_v59 = vadd.f32 %v120_v58, %v63_v56 }
  0xe5   :  { %v122_v60 = vpop.f32.mrf.mxu0 }
  0xe6   :  { %v123_v61 = vadd.f32 %v122_v60, %v67_v57  ;;  %v127_v62 = vmax.f32 %v121_v59, 0.0 }
  0xe7   :  { %v124_v63 = vpop.f32.mrf.mxu0 }
  0xe8   :  { %v128_v0 = vmax.f32 %v123_v61, 0.0  ;;  %v129_v3 = vpack.c.bf16 %v127_v62, %v127_v62 }
  0xe9   :  { %v125_v1 = vpop.f32.mrf.mxu0 }
  0xea   :  { %v130_v2 = vpack.c.bf16 %v128_v0, %v128_v0 }
  0xec   :  { %367 = vmatprep.mubr.bf16.mxu1 %v130_v2 }
  0xed   :  { %368 = vmatmul.mubr.bf16.vlgmr.msra.gmra.mxu1 %v129_v3 }
 0x1ad   :  { %v369_v11 = vpop.f32.mrf.mxu1 }
 0x1ae   :  { %v370_v12 = vadd.f32 %v369_v11, %v168_v9 }
 0x1af   :  { %v371_v13 = vpop.f32.mrf.mxu1 }
 0x1b0   :  { %v372_v14 = vadd.f32 %v371_v13, %v172_v10  ;;  %v376_v15 = vmax.f32 %v370_v12, 0.0 }
 0x1b1   :  { %v373_v16 = vpop.f32.mrf.mxu1 }
 0x1b2   :  { %v377_v17 = vmax.f32 %v372_v14, 0.0  ;;  %v378_v20 = vpack.c.bf16 %v376_v15, %v376_v15 }
 0x1b3   :  { %v374_v18 = vpop.f32.mrf.mxu1 }
 0x1b4   :  { %v379_v19 = vpack.c.bf16 %v377_v17, %v377_v17 }
 0x1b6   :  { %547 = vmatprep.mubr.bf16.mxu0 %v379_v19 }
 0x1b7   :  { %548 = vmatmul.mubr.bf16.vlgmr.msra.gmra.mxu0 %v378_v20 }
 0x277   :  { %v631_v21 = vpop.f32.mrf.mxu0 }
 0x279   :  { %v632_v23 = vpop.f32.mrf.mxu0 }
 0x27a   :  { %v633_v24 = vadd.f32 %v632_v23, %v631_v21 }
 0x27b   :  { %v634_v25 = vpop.f32.mrf.mxu0 }
 0x27c   :  { %v550_v26 = vadd.f32 %v633_v24, %v598_v22 }
 0x27d   :  { %v635_v27 = vpop.f32.mrf.mxu0 }
 0x27e   :  { %555 = vst [vmem:[%s832_s7] sm:$0xff] %v550_v26 }
 0x27f   :  { %560 = vsyncpa [#allocation3], 1 }
 0x280   :  { %561 = vsyncpa [#allocation5], 1 }

</bundles_post_ra>
